<compile_context>
chip_gen: v7x
topology: tpu7x:2x2x1
jax: 0.10.0
libtpu: 0.0.40
codegen_flags: <defaults>
</compile_context>

<pallas_src>
import functools

import jax
import jax.numpy as jnp
from jax.experimental import pallas as pl
from jax.experimental.pallas import tpu as pltpu


# ---------------------------------------------------------------------------
# Kernel
# ---------------------------------------------------------------------------
def shift_sequence_kernel(*refs, instructions, tile_len, need_prev, need_next,
                          halo):
    """refs = (x_cur, [x_prev_halo], [x_next_halo], out).

    Blocks: x_cur is (TB, TL, D), halo blocks are (1, h, D),
    out is (TB, TL, out_dim).
    """
    i = 0
    x_cur = refs[i]; i += 1
    x_prev = None
    x_next = None
    if need_prev:
        x_prev = refs[i]; i += 1
    if need_next:
        x_next = refs[i]; i += 1
    o_ref = refs[i]

    tb = o_ref.shape[0]
    t = pl.program_id(1)
    last = pl.num_programs(1) - 1

    # Static per-instruction layout: (src_start, src_end, shift, out_offset).
    chunks = []
    off = 0
    for ins in instructions:
        s, e = ins["features"]
        chunks.append((s, e, ins["relative_pos"], off))
        off += e - s

    # ---- interior rows: sourced entirely from the current tile ------------
    for s, e, a, off in chunks:
        w = e - s
        if a == 0:
            o_ref[:, :, off:off + w] = x_cur[:, :, s:e]
        elif a > 0:
            if a < tile_len:
                o_ref[:, 0:tile_len - a, off:off + w] = x_cur[:, a:tile_len, s:e]
        else:
            m = -a
            if m < tile_len:
                o_ref[:, m:tile_len, off:off + w] = x_cur[:, 0:tile_len - m, s:e]

    pos_chunks = [c for c in chunks if c[2] > 0]
    neg_chunks = [c for c in chunks if c[2] < 0]

    # ---- tail rows (a > 0): next-tile halo; zeros on the last tile --------
    def tails_from_next():
        for s, e, a, off in pos_chunks:
            o_ref[:, tile_len - a:tile_len, off:off + (e - s)] = x_next[:, 0:a, s:e]

    def tails_zero():
        for s, e, a, off in pos_chunks:
            o_ref[:, tile_len - a:tile_len, off:off + (e - s)] = jnp.zeros(
                (tb, a, e - s), dtype=o_ref.dtype)

    if pos_chunks:
        if need_next:
            pl.when(t != last)(tails_from_next)
            pl.when(t == last)(tails_zero)
        else:
            tails_zero()

    # ---- head rows (a < 0): prev-tile halo; zeros on the first tile -------
    def heads_from_prev():
        for s, e, a, off in neg_chunks:
            m = -a
            o_ref[:, 0:m, off:off + (e - s)] = x_prev[:, halo - m:halo, s:e]

    def heads_zero():
        for s, e, a, off in neg_chunks:
            m = -a
            o_ref[:, 0:m, off:off + (e - s)] = jnp.zeros(
                (tb, m, e - s), dtype=o_ref.dtype)

    if neg_chunks:
        if need_prev:
            pl.when(t != 0)(heads_from_prev)
            pl.when(t == 0)(heads_zero)
        else:
            heads_zero()


# ---------------------------------------------------------------------------
# Block / tile selection helpers
# ---------------------------------------------------------------------------
def _normalize_instructions(instructions):
    return tuple(
        {"features": (int(ins["features"][0]), int(ins["features"][1])),
         "relative_pos": int(ins["relative_pos"])}
        for ins in instructions)


def _divisors(n):
    return [d for d in range(1, n + 1) if n % d == 0]


def _sublane_pack(itemsize):
    # Sub-32-bit dtypes pack along sublanes; keep block rows on pack granularity.
    return {1: 32, 2: 16}.get(itemsize, 8)


def _halo_rows(tile_len, max_shift, pack):
    """Smallest sublane-aligned divisor of tile_len covering max_shift rows."""
    cands = [h for h in _divisors(tile_len) if h % pack == 0 and h >= max_shift]
    if not cands:
        cands = [h for h in _divisors(tile_len) if h % 8 == 0 and h >= max_shift]
    return min(cands) if cands else tile_len


def _vmem_capacity_bytes():
    try:
        cap = getattr(pltpu.get_tpu_info(), "vmem_capacity_bytes", None)
        if cap:
            return int(cap)
    except Exception:
        pass
    return 64 * 1024 * 1024  # conservative fallback: v7x per-TensorCore VMEM


def _choose_blocks(B, L, D, out_dim, itemsize, max_shift,
                   need_prev_any, need_next_any, pack, budget):
    """Pick (batch_block, tile_len, halo_rows) under the VMEM budget."""
    n_halos = int(need_prev_any) + int(need_next_any)

    def est(tb, tl, h):  # double-buffered input block(s) + output block
        halos = h * D * n_halos if tl < L else 0
        return 2 * itemsize * (tb * tl * (D + out_dim) + halos)

    # Untiled path: whole sequence per step -> no halo traffic.  Block several
    # batch rows per step to amortize per-step overhead, but keep >= min(B, 4)
    # grid steps so the grid can pipeline / megacore-shard.
    untiled = None
    if est(1, L, 0) <= budget:
        tb = 1
        target_steps = min(B, 4)
        for cand in sorted(_divisors(B), reverse=True):
            if cand == 1:
                break
            if B // cand >= target_steps and est(cand, L, 0) <= budget:
                tb = cand
                break
        untiled = (tb, L, 0)

    # Tiled path: largest sublane-aligned sequence tile that fits (with its
    # small halo).  Prefer dtype-pack-aligned tiles.
    tiled_cands = [d for d in _divisors(L)
                   if d < L and d % 8 == 0 and d >= max(max_shift, 1)]
    tiled_cands.sort(key=lambda d: (d % pack == 0, d), reverse=True)
    tiled = None
    for tl in tiled_cands:
        h = _halo_rows(tl, max_shift, pack) if n_halos else 0
        if est(1, tl, h) <= budget:
            tiled = (1, tl, h)
            break

    if untiled is not None:
        if B == 1 and tiled is not None:
            # A (1, 1) grid leaves one v7x TensorCore idle: with a single batch
            # row, prefer >= 2 sequence tiles when the halo overhead is small
            # (<= ~12.5% extra input reads).
            _, tl_t, h_t = tiled
            if h_t * n_halos * 8 <= tl_t:
                return tiled
        return untiled
    if tiled is not None:
        return tiled
    # Nothing fits the budget: smallest legal config; the caller validates it
    # against physical VMEM and raises if it cannot possibly fit.
    if tiled_cands:
        tl = min(tiled_cands)
        return (1, tl, _halo_rows(tl, max_shift, pack) if n_halos else 0)
    return (1, L, 0)


# ---------------------------------------------------------------------------
# Wrapper
# ---------------------------------------------------------------------------
def shift_sequence(x, instructions, *, tile_len=None, batch_block=None,
                   vmem_budget_bytes=None):
    """Pallas TPU implementation of the ShiftSequence forward pass."""
    B, L, D = x.shape
    instructions = _normalize_instructions(instructions)
    assert instructions, "ShiftSequence needs at least one instruction."
    out_dim = 0
    for ins in instructions:
        s, e = ins["features"]
        assert 0 <= s <= e <= D, (s, e, D)
        out_dim += e - s
    shifts = [ins["relative_pos"] for ins in instructions]
    max_shift = max(abs(a) for a in shifts)
    assert max_shift <= L, f"|relative_pos| ({max_shift}) must be <= len_input ({L})"

    itemsize = x.dtype.itemsize
    pack = _sublane_pack(itemsize)
    need_prev_any = any(a < 0 for a in shifts)
    need_next_any = any(a > 0 for a in shifts)

    vmem_capacity = _vmem_capacity_bytes()
    if vmem_budget_bytes is None:
        # ~48 MiB on v5e/v6e (128 MiB VMEM), ~24 MiB on v7x (64 MiB VMEM).
        vmem_budget_bytes = (vmem_capacity * 3) // 8

    if tile_len is None:
        tb, tile_len, halo = _choose_blocks(
            B, L, D, out_dim, itemsize, max_shift,
            need_prev_any, need_next_any, pack, vmem_budget_bytes)
        n_tiles = L // tile_len
    else:
        tile_len = int(tile_len)
        assert L % tile_len == 0, (L, tile_len)
        assert tile_len == L or tile_len % 8 == 0, tile_len
        assert tile_len >= max_shift, (tile_len, max_shift)
        n_tiles = L // tile_len
        tb = int(batch_block) if batch_block else 1
        assert B % tb == 0, (B, tb)
        assert n_tiles == 1 or tb == 1, "batch blocking only on the untiled path"
        halo = (_halo_rows(tile_len, max_shift, pack)
                if (n_tiles > 1 and (need_prev_any or need_next_any)) else 0)

    need_prev = need_prev_any and n_tiles > 1
    need_next = need_next_any and n_tiles > 1
    n_halos = int(need_prev) + int(need_next)
    if n_halos == 0:
        halo = 0

    kernel = functools.partial(
        shift_sequence_kernel,
        instructions=instructions,
        tile_len=tile_len,
        need_prev=need_prev,
        need_next=need_next,
        halo=halo,
    )

    in_specs = [pl.BlockSpec((tb, tile_len, D), lambda b, t: (b, t, 0))]
    inputs = [x]
    if n_halos:
        r = tile_len // halo                # halo blocks per sequence tile
        last_halo_blk = L // halo - 1
        if need_prev:
            in_specs.append(pl.BlockSpec(
                (1, halo, D),
                lambda b, t, r=r: (b, jnp.maximum(t * r - 1, 0), 0)))
            inputs.append(x)
        if need_next:
            in_specs.append(pl.BlockSpec(
                (1, halo, D),
                lambda b, t, r=r, m=last_halo_blk: (b, jnp.minimum((t + 1) * r, m), 0)))
            inputs.append(x)

    # VMEM accounting: double-buffered inputs + output block per pipeline step.
    est_step = 2 * itemsize * (tb * tile_len * (D + out_dim) + halo * D * n_halos)
    vmem_cap = (vmem_capacity * 3) // 4     # leave headroom for compiler scratch
    if est_step > vmem_cap:
        raise ValueError(
            f"ShiftSequence block config needs ~{est_step} bytes of VMEM, which "
            f"exceeds the safe limit of {vmem_cap} bytes; pass a smaller tile_len.")
    vmem_limit = int(min(max(2 * est_step, 16 * 1024 * 1024), vmem_cap))

    cost = pl.CostEstimate(
        flops=0,
        transcendentals=0,
        bytes_accessed=int(itemsize * (B * L * (D + out_dim)
                                       + (B // tb) * n_tiles * halo * D * n_halos)),
    )

    return pl.pallas_call(
        kernel,
        out_shape=jax.ShapeDtypeStruct((B, L, out_dim), x.dtype),
        grid=(B // tb, n_tiles),
        in_specs=in_specs,
        out_specs=pl.BlockSpec((tb, tile_len, out_dim), lambda b, t: (b, t, 0)),
        compiler_params=pltpu.CompilerParams(
            dimension_semantics=("parallel", "parallel"),
            vmem_limit_bytes=vmem_limit,
        ),
        cost_estimate=cost,
    )(*inputs)


# ---------------------------------------------------------------------------
# Pure-JAX reference mirroring the torch forward
# ---------------------------------------------------------------------------
def shift_sequence_ref(x, instructions):
    L = x.shape[1]
    outs = []
    for ins in instructions:
        s, e = ins["features"]
        a = int(ins["relative_pos"])
        chunk = x[..., s:e]
        if a == 0:
            shifted = chunk
        elif a > 0:
            pad = jnp.zeros((chunk.shape[0], a, chunk.shape[2]), chunk.dtype)
            shifted = jnp.concatenate([chunk[:, a:, :], pad], axis=1)
        else:
            pad = jnp.zeros((chunk.shape[0], -a, chunk.shape[2]), chunk.dtype)
            shifted = jnp.concatenate([pad, chunk[:, : L + a, :]], axis=1)
        outs.append(shifted)
    return jnp.concatenate(outs, axis=-1)


if __name__ == "__main__":
    key = jax.random.PRNGKey(0)
    k1, k2, k3, k4, k5 = jax.random.split(key, 5)

    def check(name, x, instructions, **kw):
        out = jax.block_until_ready(shift_sequence(x, instructions, **kw))
        ref = shift_sequence_ref(x, instructions)
        assert out.shape == ref.shape, (name, out.shape, ref.shape)
        assert jnp.allclose(out, ref, atol=1e-6, rtol=1e-6), \
            f"mismatch vs reference ({name})"

    # 1) Module-layout small shapes [BSZ, len_input, input_dim]; untiled path
    #    (single sequence block, no halos).
    ins1 = [
        {"features": (0, 8), "relative_pos": 0},
        {"features": (4, 12), "relative_pos": 1},
        {"features": (8, 16), "relative_pos": -2},
    ]  # output_dim = 24
    x1 = jax.random.normal(k1, (2, 8, 16), dtype=jnp.float32)
    check("untiled", x1, ins1)

    # 2) Forced sequence tiling with a shift equal to tile_len (halo == tile).
    ins2 = [
        {"features": (0, 8), "relative_pos": 3},
        {"features": (4, 12), "relative_pos": -5},
        {"features": (8, 16), "relative_pos": 0},
        {"features": (0, 16), "relative_pos": 8},
    ]  # output_dim = 40
    x2 = jax.random.normal(k2, (2, 32, 16), dtype=jnp.float32)
    check("tiled, halo==tile", x2, ins2, tile_len=8)

    # 3) Forced sequence tiling where the halo (8 rows) is smaller than the
    #    tile (32 rows) -> reduced-traffic halo path.
    ins3 = [
        {"features": (0, 8), "relative_pos": 3},
        {"features": (2, 10), "relative_pos": -2},
        {"features": (8, 16), "relative_pos": 0},
    ]  # output_dim = 24
    x3 = jax.random.normal(k3, (2, 64, 16), dtype=jnp.float32)
    check("tiled, small halo", x3, ins3, tile_len=32)

    # 4) Auto chooser blocks several batch rows per step (TB > 1, untiled).
    x4 = jax.random.normal(k4, (8, 8, 16), dtype=jnp.float32)
    check("batch-blocked", x4, ins1)

    # 5) B == 1 megacore split: auto chooser picks >= 2 sequence tiles.
    ins5 = [
        {"features": (0, 4), "relative_pos": 2},
        {"features": (2, 8), "relative_pos": -3},
    ]  # output_dim = 10
    x5 = jax.random.normal(k5, (1, 512, 8), dtype=jnp.float32)
    check("B==1 split", x5, ins5)

    print("KERNEL_OK")
</pallas_src>

<mosaic_0001>
module attributes {stable_mosaic.version = 11 : i64} {
  func.func @shift_sequence_kernel(%arg0: i32, %arg1: i32, %arg2: memref<1x8x16xf32, #tpu.memory_space<vmem>>, %arg3: memref<1x8x24xf32, #tpu.memory_space<vmem>>) attributes {dimension_semantics = [#tpu.dimension_semantics<parallel>, #tpu.dimension_semantics<parallel>], iteration_bounds = array<i64: 2, 1>, scalar_prefetch = 0 : i64, scratch_operands = 0 : i64, tpu.core_type = #tpu.core_type<tc>, window_params = [{transform_indices = @transform_0, window_bounds = array<i64: 1, 8, 16>}, {transform_indices = @transform_1, window_bounds = array<i64: 1, 8, 24>}]} {
    %c0 = arith.constant 0 : index
    %c0_0 = arith.constant 0 : index
    %c0_1 = arith.constant 0 : index
    %0 = vector.load %arg2[%c0, %c0_0, %c0_1] : memref<1x8x16xf32, #tpu.memory_space<vmem>>, vector<1x8x8xf32>
    %c0_2 = arith.constant 0 : index
    %c0_3 = arith.constant 0 : index
    %c0_4 = arith.constant 0 : index
    %1 = vector.load %arg3[%c0_2, %c0_3, %c0_4] : memref<1x8x24xf32, #tpu.memory_space<vmem>>, vector<1x8x8xf32>
    tpu.vector_store %arg3[%c0_2, %c0_3, %c0_4], %0 {strides = array<i32>} : memref<1x8x24xf32, #tpu.memory_space<vmem>>, vector<1x8x8xf32>,
    %c0_5 = arith.constant 0 : index
    %c1 = arith.constant 1 : index
    %c4 = arith.constant 4 : index
    %2 = vector.load %arg2[%c0_5, %c1, %c4] : memref<1x8x16xf32, #tpu.memory_space<vmem>>, vector<1x7x8xf32>
    %c0_6 = arith.constant 0 : index
    %c0_7 = arith.constant 0 : index
    %c8 = arith.constant 8 : index
    %3 = vector.load %arg3[%c0_6, %c0_7, %c8] : memref<1x8x24xf32, #tpu.memory_space<vmem>>, vector<1x7x8xf32>
    tpu.vector_store %arg3[%c0_6, %c0_7, %c8], %2 {strides = array<i32>} : memref<1x8x24xf32, #tpu.memory_space<vmem>>, vector<1x7x8xf32>,
    %c0_8 = arith.constant 0 : index
    %c0_9 = arith.constant 0 : index
    %c8_10 = arith.constant 8 : index
    %4 = vector.load %arg2[%c0_8, %c0_9, %c8_10] : memref<1x8x16xf32, #tpu.memory_space<vmem>>, vector<1x6x8xf32>
    %c0_11 = arith.constant 0 : index
    %c2 = arith.constant 2 : index
    %c16 = arith.constant 16 : index
    %5 = vector.load %arg3[%c0_11, %c2, %c16] : memref<1x8x24xf32, #tpu.memory_space<vmem>>, vector<1x6x8xf32>
    tpu.vector_store %arg3[%c0_11, %c2, %c16], %4 {strides = array<i32>} : memref<1x8x24xf32, #tpu.memory_space<vmem>>, vector<1x6x8xf32>,
    %cst = arith.constant 0.000000e+00 : f32
    %6 = vector.broadcast %cst : f32 to vector<1x1x8xf32>
    %c0_12 = arith.constant 0 : index
    %c7 = arith.constant 7 : index
    %c8_13 = arith.constant 8 : index
    %7 = vector.load %arg3[%c0_12, %c7, %c8_13] : memref<1x8x24xf32, #tpu.memory_space<vmem>>, vector<1x1x8xf32>
    tpu.vector_store %arg3[%c0_12, %c7, %c8_13], %6 {strides = array<i32>} : memref<1x8x24xf32, #tpu.memory_space<vmem>>, vector<1x1x8xf32>,
    %cst_14 = arith.constant 0.000000e+00 : f32
    %8 = vector.broadcast %cst_14 : f32 to vector<1x2x8xf32>
    %c0_15 = arith.constant 0 : index
    %c0_16 = arith.constant 0 : index
    %c16_17 = arith.constant 16 : index
    %9 = vector.load %arg3[%c0_15, %c0_16, %c16_17] : memref<1x8x24xf32, #tpu.memory_space<vmem>>, vector<1x2x8xf32>
    tpu.vector_store %arg3[%c0_15, %c0_16, %c16_17], %8 {strides = array<i32>} : memref<1x8x24xf32, #tpu.memory_space<vmem>>, vector<1x2x8xf32>,
    return
  }
  func.func @transform_0(%arg0: i32, %arg1: i32) -> (i32, i32, i32) {
    %c0_i32 = arith.constant 0 : i32
    %c0_i32_0 = arith.constant 0 : i32
    return %arg0, %arg1, %c0_i32 : i32, i32, i32
  }
  func.func @transform_1(%arg0: i32, %arg1: i32) -> (i32, i32, i32) {
    %c0_i32 = arith.constant 0 : i32
    %c0_i32_0 = arith.constant 0 : i32
    return %arg0, %arg1, %c0_i32 : i32, i32, i32
  }
}

</mosaic_0001>

<bundles_post_ra>
// kernel: tpu_custom_call.1
= control target key start
LH: loop header
LB: loop body
LE: loop exit
PB: predicated region body
PF: predicated region fallthrough
CT: control target
= control target key end

     0   :  { %6 = vsyncpa [#allocation3], 0  ;;  %s644_s0 = inlined_call_operand.hbm [shape: f32[2,8,16], index: 0, kind: input, shape index: {}]   ;;  %s645_s1 = inlined_call_operand.hbm [shape: f32[2,8,24], index: 1, kind: output, shape index: {}]  }
   0x1   :  { %8 = vsyncpa [#allocation3 + $0x1], 0 }
   0x2   :  { %9 = vsyncpa [#allocation4], 0 }
   0x3   :  { %11 = vsyncpa [#allocation4 + $0x1], 0  ;;  %s472_s6 = smov 0   ;;  %s474_s7 = smov 0  }
   0x4   :  { %s476_s8 = smov 0   ;;  %s478_s9 = smov 0  }
   0x5   :  { %s480_s10 = smov 0   ;;  %s482_s11 = smov 0  }
   0x6 LB: > { %s265_s12 = sadd.s32 4294967295, %s455_s11   ;;  %s266_s13 = sadd.s32 4294967294, %s455_s11   ;;  %s455_s11 = sphi %s482_s11, %s17_s11   ;;  %s451_s10 = sphi %s480_s10, %s661_s10   ;;  %s447_s9 = sphi %s478_s9, %s660_s9   ;;  %s443_s8 = sphi %s476_s8, %s659_s8   ;;  %s439_s7 = sphi %s474_s7, %s658_s7   ;;  %s435_s6 = sphi %s472_s6, %s657_s6  }
   0x7   : > { %s29_s14 = sadd.s32 1, %s451_s10  ;;  %s38_s15 = sadd.s32 1, %s443_s8 }
   0x8   : > { %p31_p0 = scmp.ge.s32.totalorder %s29_s14, 2  ;;  %p45_p1 = scmp.ne.s32.totalorder %s443_s8, %s439_s7 }
   0x9   : > { %p46_p2 = scmp.eq.s32.totalorder %s455_s11, 0  ;;  %p51_p3 = scmp.ne.s32.totalorder %s439_s7, %s435_s6 }
   0xa   : > { %s663_s14 = smov (%p31_p0, %s29_s14), 0  ;;  %p52_p5 = scmp.eq.s32.totalorder %s265_s12, 0 }
   0xb   : > { %p513_p4 = por %p46_p2, %p45_p1  ;;  %s33_s17 = ssub.s32 %s451_s10, %s663_s14 }
   0xc   : > { %p77_p6 = scmp.eq.s32.totalorder %s265_s12, 1  ;;  %p36_p7 = scmp.eq.s32.totalorder %s33_s17, 0 }
   0xd   : > { %p519_p8 = por %p52_p5, %p51_p3  ;;  %p83_p10 = scmp.eq.s32.totalorder %s266_s13, 1 }
   0xe   : > { %p523_p9 = por %p77_p6, %p45_p1  ;;  %p290_p13 = scmp.lt.s32.totalorder %s455_s11, 2 }
   0xf   : > { %s528_s20 = scalar_select %p36_p7, %s443_s8, %s38_s15  }
  0x10   : > { %s649_s19 = scalar_select %p523_p9, 1, 0 }
  0x11   : > { %p530_p11 = por %p83_p10, %p51_p3  ;;  %s103_s22 = sand.u32 1, %s443_s8  }
  0x12   : > { %s269_s23 = sshll.u32 %s103_s22, 3  ;;  %s270_s24 = sshll.u32 %s451_s10, 7 }
  0x13   : > { %s650_s21 = scalar_select %p530_p11, 1, 0 }
  0x14   : > { %s541_s27 = scalar_lea.hbm %s644_s0, %s270_s24  ;;  %s107_s28 = scalar_lea.vmem [#allocation2], %s269_s23 }
  0x15   : > { %s115_s29 = sshll.u32 %s107_s28, 4  ;;  %p547_p0 = pnand %p290_p13, %p513_p4  ;;  %s543_s29 = int_to_ptr.vmem [resolvable:$true] %s115_s29 }
  0x16   : > { %s104_s2 = scalar_lea.sflag [#allocation3], %s103_s22  ;;  %s343_s3 = scalar_lea.hbm %s541_s27, 128 }
  0x17   : > { %p344_p3 = scmp.ne.s32.totalorder %s541_s27, %s343_s3  ;;  %p345_p5 = pneg %p547_p0 }
  0x18   : > { %s348_s12 = scalar_lea.hbm %s644_s0, 256  ;;  %p349_p4 = scmp.lt.u32.totalorder %s541_s27, %s644_s0 }
  0x19   : > { %p346_p6 = pnand %p345_p5, %p344_p3  ;;  %p350_p10 = scmp.lt.u32.totalorder %s348_s12, %s343_s3 }
  0x1a   : > { %p352_p12 = scmp.lt.u32.totalorder %s343_s3, %s541_s27 }
  0x1b   : > { %p347_p7 = pneg %p346_p6  ;;  %p351_p13 = por %p350_p10, %p349_p4 }
  0x1d   : > { %p353_p1 = por %p352_p12, %p351_p13 }
  0x1f   : > { %p354_p2 = pnand %p353_p1, %p347_p7 }
  0x21   : > { %357 = shalt.err (!%p354_p2)
}
  0x22   : > { %s358_s16 = scalar_lea.vmem %s543_s29, 128  ;;  %s457_s17 = smov [#allocation2]  }
  0x23   : > { %p359_p3 = scmp.ne.s32.totalorder %s543_s29, %s358_s16  ;;  %s363_s22 = sshll.u32 %s457_s17, 4  ;;  %s364_s22 = int_to_ptr.vmem [resolvable:$false] %s363_s22 }
  0x24   : > { %s365_s23 = scalar_lea.vmem %s364_s22, 256  ;;  %p366_p9 = scmp.lt.s32.totalorder %s543_s29, %s364_s22 }
  0x25   : > { %p361_p6 = pnand %p359_p3, %p345_p5  ;;  %p367_p4 = scmp.lt.s32.totalorder %s365_s23, %s358_s16 }
  0x27   : > { %p362_p11 = pneg %p361_p6  ;;  %p368_p10 = por %p367_p4, %p366_p9 }
  0x29   : > { %p369_p12 = pnand %p368_p10, %p362_p11 }
  0x2b   : > { %372 = shalt.err (!%p369_p12)
}
  0x2c   : > { %285 = dma.hbm_to_vmem [thread:$0]  (!%p547_p0), %s541_s27, 128, %s543_s29, %s104_s2  }
  0x2d   : > { %p652_p1 = scmp.lt.s32.totalorder %s455_s11, 3  ;;  %p653_p2 = scmp.ge.s32.totalorder %s455_s11, 1 }
  0x2f   : > { %p121_p5 = pnand %p653_p2, %p652_p1 }
  0x30   : > { %s583_s24 = sand.u32 (!%p121_p5), 1, %s439_s7  }
  0x31   : > { %124 = sbr.rel (%p121_p5) target bundleno = 192 (0xc0), region = 24  ;;  %s272_s25 = sshll.u32 (!%p121_p5), %s583_s24, 3 }
  0x32   : > { %s127_s26 = scalar_lea.sflag (!%p121_p5), [#allocation3], %s583_s24  ;;  %s130_s28 = scalar_lea.vmem (!%p121_p5), [#allocation2], %s272_s25 }
  0x38   : > { %426 = dma.done.wait (%p519_p8), %s127_s26, 128  }
  0x39   : > { %428 = vsyncadd (%p519_p8), %s127_s26, 4294967168  ;;  %vm150_vm0 = vcmask 64512   ;;  %v152_v0 = vld [vmem:[%s130_s28 + $0x1] sm:$0x7f]  ;;  %s458_s27 = smov 4   ;;  %s148_s29 = scalar_lea.vmem [#allocation5], %s272_s25 }
  0x3a   : > { %v149_v1 = vld [vmem:[%s130_s28] sm:$0xff]  ;;  %154 = vrot.lane.b32.xlu0 %v152_v0, %s458_s27  ;;  %s459_s30 = smov 8   ;;  %vm157_vm1 = vcmask 129088   ;;  %vm168_vm2 = vcmask 189568   ;;  %s275_s2 = sshll.u32 %s447_s9, 7  ;;  %vm164_vm3 = vcmask 193664  }
  0x3b   : > { %151 = vst.msk [vmem:[%s148_s29] sm:$0xff] %vm150_vm0, %v149_v1  ;;  %v159_v2 = vld [vmem:[%s130_s28] sm:$0x3f]  ;;  %s185_s18 = sshll.u32 %s148_s29, 4  ;;  %v460_v4 = vmov 0.0   ;;  %vm166_vm4 = vcmask 122944   ;;  %s595_s5 = scalar_lea.hbm %s645_s1, %s275_s2  ;;  %s597_s18 = int_to_ptr.vmem [resolvable:$true] %s185_s18 }
  0x3c   : > { %s171_s12 = scalar_lea.sflag [#allocation4], %s583_s24  ;;  %s373_s9 = scalar_lea.vmem %s597_s18, 128 }
  0x3d   : > { %p374_p8 = scmp.ne.s32.totalorder %s597_s18, %s373_s9  ;;  %p654_p9 = scmp.ne.s32.totalorder %s649_s19, 0 }
  0x3e   : > { %161 = vrot.lane.b32.xlu0 %v159_v2, %s459_s30  ;;  %s461_s13 = smov [#allocation5]  }
  0x3f   : > { %p375_p11 = pnand %p374_p8, %p654_p9  ;;  %s377_s15 = sshll.u32 %s461_s13, 4  ;;  %s378_s15 = int_to_ptr.vmem [resolvable:$false] %s377_s15 }
  0x40   : > { %s379_s16 = scalar_lea.vmem %s378_s15, 256  ;;  %p380_p7 = scmp.lt.s32.totalorder %s597_s18, %s378_s15 }
  0x41   : > { %p376_p0 = pneg %p375_p11  ;;  %p381_p13 = scmp.lt.s32.totalorder %s379_s16, %s373_s9 }
  0x43   : > { %p382_p3 = por %p381_p13, %p380_p7 }
  0x45   : > { %p383_p6 = pnand %p382_p3, %p376_p0 }
  0xac   : > { %v155_v3 = vpop.permute.xlu0 %154 }
  0xad   : > { %158 = vst.msk [vmem:[%s148_s29] sm:$0x7f] %vm157_vm1, %v155_v3 }
  0xae   : > { %169 = vst.msk [vmem:[%s148_s29] sm:$0x3] %vm168_vm2, %v460_v4 }
  0xb0   : > { %v162_v5 = vpop.permute.xlu0 %161 }
  0xb1   : > { %165 = vst.msk [vmem:[%s148_s29 + $0x2] sm:$0x3f] %vm164_vm3, %v162_v5 }
  0xb2   : > { %167 = vst.msk [vmem:[%s148_s29 + $0x7] sm:$0x1] %vm166_vm4, %v460_v4 }
  0xb3   : > { %386 = shalt.err (!%p383_p6)
}
  0xb4   : > { %s387_s17 = scalar_lea.hbm %s595_s5, 128  ;;  %s391_s24 = scalar_lea.hbm %s645_s1, 256 }
  0xb5   : > { %p388_p4 = scmp.ne.s32.totalorder %s595_s5, %s387_s17  ;;  %p392_p1 = scmp.lt.u32.totalorder %s595_s5, %s645_s1 }
  0xb6   : > { %p393_p2 = scmp.lt.u32.totalorder %s391_s24, %s387_s17  ;;  %p395_p8 = scmp.lt.u32.totalorder %s387_s17, %s595_s5 }
  0xb7   : > { %p389_p10 = pnand %p388_p4, %p654_p9 }
  0xb8   : > { %p394_p5 = por %p393_p2, %p392_p1 }
  0xb9   : > { %p390_p12 = pneg %p389_p10 }
  0xba   : > { %p396_p11 = por %p395_p8, %p394_p5 }
  0xbc   : > { %p397_p0 = pnand %p396_p11, %p390_p12 }
  0xbe   : > { %400 = shalt.err (!%p397_p0)
}
  0xbf   : > { %280 = dma.vmem_to_hbm [thread:$0]  (%p654_p9), %s597_s18, 128, %s595_s5, %s171_s12  }
  0xc0 PF: > { %s197_s28 = sand.u32 1, %s435_s6   ;;  %p655_p7 = scmp.ne.s32.totalorder %s650_s21, 0 }
  0xc1   : > { %p656_p13 = scmp.ge.s32.totalorder %s455_s11, 2  ;;  %s198_s27 = scalar_lea.sflag [#allocation4], %s197_s28 }
  0xc3   : > { %p287_p3 = pnand %p656_p13, %p655_p7 }
  0xc5   : > { %430 = dma.done.wait (!%p287_p3), %s198_s27, 128  }
  0xc6   : > { %432 = vsyncadd (!%p287_p3), %s198_s27, 4294967168  ;;  %s17_s11 = sadd.s32 1, %s455_s11   ;;  %s657_s6 = smov %s439_s7 }
  0xc7   : > { %p14_p6 = scmp.ge.s32.totalorder %s17_s11, 4   ;;  %s658_s7 = smov %s443_s8 }
  0xc8   : > { %s659_s8 = smov %s528_s20  ;;  %s660_s9 = smov %s451_s10 }
  0xc9   : > { %s661_s10 = smov %s663_s14  ;;  %16 = sbr.rel (!%p14_p6) target bundleno = 6 (0x6), region = 69 }
  0xd0   :  { %203 = vsyncpa [#allocation3], 1 }
  0xd1   :  { %205 = vsyncpa [#allocation3 + $0x1], 1 }
  0xd2   :  { %206 = vsyncpa [#allocation4], 1 }
  0xd3   :  { %208 = vsyncpa [#allocation4 + $0x1], 1 }

</bundles_post_ra>
